<compile_context>
chip_gen: v6e
topology: v6e:2x2x1
jax: 0.10.0
libtpu: 0.0.40
codegen_flags: <defaults>
</compile_context>

<pallas_src>
import numpy as np

import jax
import jax.numpy as jnp
from jax.experimental import pallas as pl
from jax.experimental.pallas import tpu as pltpu

# ----------------------------------------------------------------------------
# Static model configuration (input_shape=(4,16,16), batch=2, labels=10)
# ----------------------------------------------------------------------------
N, CIN, H, W = 2, 4, 16, 16
COUT, KH, KW = 8, 3, 3
OH, OW = H - KH + 1, W - KW + 1          # 14, 14
PH, PW = OH // 2, OW // 2                # 7, 7
HIDDEN, LABELS = 32, 10
FLAT = COUT * PH * PW                    # 392  (torch NCHW flatten size)
WC = W * CIN                             # 64   input lane width  (w*CIN + cin)
PWC = PW * COUT                          # 56   pooled lane width (pw*COUT + co)
ROWS = N * 8                             # 16 pooled rows: 0-6 n0, 7 junk, 8-14 n1, 15 junk
XROWS = N * H + 2                        # 34: 2 zero rows so 16-row stride-2 loads stay in-bounds


def _tree_sum(xs):
    xs = list(xs)
    while len(xs) > 1:
        nxt = [xs[i] + xs[i + 1] for i in range(0, len(xs) - 1, 2)]
        if len(xs) % 2:
            nxt.append(xs[-1])
        xs = nxt
    return xs[0]


# ----------------------------------------------------------------------------
# Fused kernel: conv + ReLU + maxpool + flatten + fc1 + ReLU + fc2
# ----------------------------------------------------------------------------
def fused_forward_kernel(x_ref, wc_ref, bc_ref, w1_ref, b1_ref, w2_ref, b2_ref,
                         o_ref, pooled_ref):
    """All operands live in VMEM; single program (no grid).

    x_ref      : (34, 64)  f32  NHWC input slab (2 trailing zero rows)
    wc_ref     : (3, 64, 128) bf16  conv weight per kernel-row di; lanes 0:56
                 are the dx=0 pooling offset, lanes 64:120 the dx=1 offset
    bc_ref     : (1, 64)  f32   conv bias tiled over pw (lanes 56:64 zero)
    w1_ref     : (7, 64, 32) bf16  fc1 weight per ph, NCHW flatten absorbed
    b1_ref     : (1, 32)  f32
    w2_ref     : (32, 10) bf16
    b2_ref     : (1, 10)  f32
    o_ref      : (2, 10)  f32
    pooled_ref : (16, 64) f32 VMEM scratch (pooled conv activations)
    """
    # ---- conv + ReLU + 2x2 maxpool (both samples in the M dimension) ------
    # 4 deduplicated stride-2 row loads, shared across (dy, di) taps and both
    # samples; result row r covers (n = r // 8, ph = r % 8), rows 7/15 junk.
    lhs = [x_ref[pl.ds(s, ROWS, stride=2), :].astype(jnp.bfloat16)
           for s in range(KH + 1)]

    accs = []
    for dy in range(2):
        acc = jnp.dot(lhs[dy], wc_ref[0], preferred_element_type=jnp.float32)
        for di in range(1, KH):
            acc = acc + jnp.dot(lhs[dy + di], wc_ref[di],
                                preferred_element_type=jnp.float32)
        accs.append(acc)                              # (16, 128)
    res = jnp.maximum(accs[0], accs[1])               # max over dy
    res = jnp.maximum(res[:, 0:64], res[:, 64:128])   # max over dx -> (16, 64)
    # bias + ReLU commute with the window max (bias constant, ReLU monotone)
    pooled_ref[...] = jnp.maximum(res + bc_ref[...], 0.0)
    # TODO(synk): Dropout2d / Dropout are identity at inference and omitted.

    # ---- fc1 + ReLU: NCHW flatten absorbed into w1's row order ------------
    hs = []
    for ph in range(PH):
        rows = pooled_ref[pl.ds(ph, 2, stride=8), :]   # rows (ph, ph+8) = both samples
        hs.append(jnp.dot(rows.astype(jnp.bfloat16), w1_ref[ph],
                          preferred_element_type=jnp.float32))
    h = jnp.maximum(_tree_sum(hs) + b1_ref[...], 0.0)  # (2, 32)

    # ---- fc_labels head ----------------------------------------------------
    out = jnp.dot(h.astype(jnp.bfloat16), w2_ref[...],
                  preferred_element_type=jnp.float32) + b2_ref[...]
    o_ref[...] = out.astype(o_ref.dtype)


# ----------------------------------------------------------------------------
# Parameter repacking (one time, at setup) + wrapper
# ----------------------------------------------------------------------------
def prepare_params(tp):
    """Repack PyTorch-layout params into the kernel's fused layouts."""
    conv_w = tp["conv_w"]                 # (COUT, CIN, KH, KW)
    conv_b = tp["conv_b"]                 # (COUT,)
    fc1_w = tp["fc1_w"]                   # (HIDDEN, FLAT) rows: co*PH*PW+ph*PW+pw
    fc1_b = tp["fc1_b"]                   # (HIDDEN,)
    fc2_w = tp["fc2_w"]                   # (LABELS, HIDDEN)
    fc2_b = tp["fc2_b"]                   # (LABELS,)

    # Selection tensor: input column w feeds pooled column pw at tap dj, offset dx.
    sel = np.zeros((2, KW, PW, W), np.float32)
    for dx in range(2):
        for dj in range(KW):
            for pw in range(PW):
                sel[dx, dj, pw, 2 * pw + dx + dj] = 1.0
    sel = jnp.asarray(sel)
    # wbig[dx, di, w*CIN+cin, pw*COUT+co] = conv_w[co, cin, di, dj] iff w == 2*pw+dx+dj
    wbig = jnp.einsum("xjpw,ocij->xiwcpo", sel, conv_w).reshape(2, KH, WC, PWC)

    # Fold the dx pooling offset into the matmul N dimension (128 lanes:
    # 0:56 -> dx=0, 64:120 -> dx=1, rest zero).
    zpad = jnp.zeros((KH, WC, 64 - PWC), jnp.float32)
    wcat = jnp.concatenate([wbig[0], zpad, wbig[1], zpad], axis=-1)  # (KH, 64, 128)

    bc = jnp.pad(jnp.tile(conv_b, (PW,)), (0, 64 - PWC)).reshape(1, 64)

    # fc1 weight: reorder rows from torch NCHW-flatten (co, ph, pw) to (ph, pw, co),
    # zero-pad the lane axis to 64 (matches pooled scratch lanes 56:64 == 0).
    w1 = fc1_w.reshape(HIDDEN, COUT, PH, PW)
    w1 = jnp.transpose(w1, (2, 3, 1, 0)).reshape(PH, PWC, HIDDEN)
    w1 = jnp.pad(w1, ((0, 0), (0, 64 - PWC), (0, 0)))                # (PH, 64, HIDDEN)

    return {
        "wc": wcat.astype(jnp.bfloat16),
        "bc": bc,
        "w1": w1.astype(jnp.bfloat16),
        "b1": fc1_b.reshape(1, HIDDEN),
        "w2": jnp.transpose(fc2_w, (1, 0)).astype(jnp.bfloat16),
        "b2": fc2_b.reshape(1, LABELS),
    }


def _vmem():
    return pl.BlockSpec(memory_space=pltpu.MemorySpace.VMEM)


def model_forward(x_nchw, kp):
    # NCHW -> NHWC -> 2D slab (channels fastest on the lane axis) + 2 zero rows
    # so the batched 16-row stride-2 loads stay in-bounds.
    x2d = jnp.transpose(x_nchw, (0, 2, 3, 1)).reshape(N * H, WC)
    x2d = jnp.pad(x2d, ((0, XROWS - N * H), (0, 0)))

    flops = (2 * N * OH * OW * KH * KW * CIN * COUT
             + 2 * N * FLAT * HIDDEN
             + 2 * N * HIDDEN * LABELS)
    bytes_accessed = int(4 * x2d.size
                         + 2 * (kp["wc"].size + kp["w1"].size + kp["w2"].size)
                         + 4 * (kp["bc"].size + kp["b1"].size + kp["b2"].size
                                + N * LABELS))

    return pl.pallas_call(
        fused_forward_kernel,
        out_shape=jax.ShapeDtypeStruct((N, LABELS), jnp.float32),
        in_specs=[_vmem()] * 7,
        out_specs=_vmem(),
        scratch_shapes=[pltpu.VMEM((ROWS, 64), jnp.float32)],
        cost_estimate=pl.CostEstimate(flops=flops, transcendentals=0,
                                      bytes_accessed=bytes_accessed),
    )(x2d, kp["wc"], kp["bc"], kp["w1"], kp["b1"], kp["w2"], kp["b2"])


# ----------------------------------------------------------------------------
# Main
# ----------------------------------------------------------------------------
if __name__ == "__main__":
    key = jax.random.PRNGKey(0)
    ks = jax.random.split(key, 8)

    def uinit(k, shape, fan_in):
        bound = 1.0 / (fan_in ** 0.5)
        return jax.random.uniform(k, shape, jnp.float32, -bound, bound)

    # Parameters in PyTorch layouts (Conv2d / Linear conventions).
    torch_params = {
        "conv_w": uinit(ks[1], (COUT, CIN, KH, KW), CIN * KH * KW),
        "conv_b": uinit(ks[2], (COUT,), CIN * KH * KW),
        "fc1_w": uinit(ks[3], (HIDDEN, FLAT), FLAT),
        "fc1_b": uinit(ks[4], (HIDDEN,), FLAT),
        "fc2_w": uinit(ks[5], (LABELS, HIDDEN), HIDDEN),
        "fc2_b": uinit(ks[6], (LABELS,), HIDDEN),
    }
    kparams = prepare_params(torch_params)   # one-time repack (setup-time, free)

    x = jax.random.normal(ks[0], (N, CIN, H, W), jnp.float32)

    out = jax.jit(model_forward)(x, kparams)
    jax.block_until_ready(out)
    assert out.shape == (N, LABELS), out.shape
    assert bool(jnp.all(jnp.isfinite(out)))
    print("KERNEL_OK")
</pallas_src>

<mosaic_0001>
module attributes {stable_mosaic.version = 11 : i64} {
  func.func @fused_forward_kernel(%arg0: memref<34x64xf32, #tpu.memory_space<vmem>>, %arg1: memref<3x64x128xbf16, #tpu.memory_space<vmem>>, %arg2: memref<1x64xf32, #tpu.memory_space<vmem>>, %arg3: memref<7x64x32xbf16, #tpu.memory_space<vmem>>, %arg4: memref<1x32xf32, #tpu.memory_space<vmem>>, %arg5: memref<32x10xbf16, #tpu.memory_space<vmem>>, %arg6: memref<1x10xf32, #tpu.memory_space<vmem>>, %arg7: memref<2x10xf32, #tpu.memory_space<vmem>>, %arg8: memref<16x64xf32, #tpu.memory_space<vmem>>) attributes {dimension_semantics = [], scalar_prefetch = 0 : i64, scratch_operands = 1 : i64, tpu.core_type = #tpu.core_type<tc>} {
    %c0 = arith.constant 0 : index
    %c0_0 = arith.constant 0 : index
    %0 = tpu.strided_load %arg0[%c0, %c0_0] {strides = array<i32: 2, 1>} : memref<34x64xf32, #tpu.memory_space<vmem>>, vector<16x64xf32>
    %1 = arith.truncf %0 : vector<16x64xf32> to vector<16x64xbf16>
    %c1 = arith.constant 1 : index
    %c0_1 = arith.constant 0 : index
    %2 = tpu.strided_load %arg0[%c1, %c0_1] {strides = array<i32: 2, 1>} : memref<34x64xf32, #tpu.memory_space<vmem>>, vector<16x64xf32>
    %3 = arith.truncf %2 : vector<16x64xf32> to vector<16x64xbf16>
    %c2 = arith.constant 2 : index
    %c0_2 = arith.constant 0 : index
    %4 = tpu.strided_load %arg0[%c2, %c0_2] {strides = array<i32: 2, 1>} : memref<34x64xf32, #tpu.memory_space<vmem>>, vector<16x64xf32>
    %5 = arith.truncf %4 : vector<16x64xf32> to vector<16x64xbf16>
    %c3 = arith.constant 3 : index
    %c0_3 = arith.constant 0 : index
    %6 = tpu.strided_load %arg0[%c3, %c0_3] {strides = array<i32: 2, 1>} : memref<34x64xf32, #tpu.memory_space<vmem>>, vector<16x64xf32>
    %7 = arith.truncf %6 : vector<16x64xf32> to vector<16x64xbf16>
    %c0_4 = arith.constant 0 : index
    %c0_5 = arith.constant 0 : index
    %c0_6 = arith.constant 0 : index
    %8 = vector.load %arg1[%c0_4, %c0_5, %c0_6] : memref<3x64x128xbf16, #tpu.memory_space<vmem>>, vector<1x64x128xbf16>
    %9 = vector.shape_cast %8 : vector<1x64x128xbf16> to vector<64x128xbf16>
    %cst = arith.constant dense<0.000000e+00> : vector<16x128xf32>
    %10 = tpu.matmul %1, %9, %cst {dimension_numbers = #tpu.dot_dimension_numbers<[1], [0], [0], [1], [0, 0, 1, 1], [], []>} : vector<16x64xbf16>, vector<64x128xbf16>, vector<16x128xf32> -> vector<16x128xf32>
    %c1_7 = arith.constant 1 : index
    %c0_8 = arith.constant 0 : index
    %c0_9 = arith.constant 0 : index
    %11 = vector.load %arg1[%c1_7, %c0_8, %c0_9] : memref<3x64x128xbf16, #tpu.memory_space<vmem>>, vector<1x64x128xbf16>
    %12 = vector.shape_cast %11 : vector<1x64x128xbf16> to vector<64x128xbf16>
    %cst_10 = arith.constant dense<0.000000e+00> : vector<16x128xf32>
    %13 = tpu.matmul %3, %12, %cst_10 {dimension_numbers = #tpu.dot_dimension_numbers<[1], [0], [0], [1], [0, 0, 1, 1], [], []>} : vector<16x64xbf16>, vector<64x128xbf16>, vector<16x128xf32> -> vector<16x128xf32>
    %14 = arith.addf %10, %13 : vector<16x128xf32>
    %c2_11 = arith.constant 2 : index
    %c0_12 = arith.constant 0 : index
    %c0_13 = arith.constant 0 : index
    %15 = vector.load %arg1[%c2_11, %c0_12, %c0_13] : memref<3x64x128xbf16, #tpu.memory_space<vmem>>, vector<1x64x128xbf16>
    %16 = vector.shape_cast %15 : vector<1x64x128xbf16> to vector<64x128xbf16>
    %cst_14 = arith.constant dense<0.000000e+00> : vector<16x128xf32>
    %17 = tpu.matmul %5, %16, %cst_14 {dimension_numbers = #tpu.dot_dimension_numbers<[1], [0], [0], [1], [0, 0, 1, 1], [], []>} : vector<16x64xbf16>, vector<64x128xbf16>, vector<16x128xf32> -> vector<16x128xf32>
    %18 = arith.addf %14, %17 : vector<16x128xf32>
    %c0_15 = arith.constant 0 : index
    %c0_16 = arith.constant 0 : index
    %c0_17 = arith.constant 0 : index
    %19 = vector.load %arg1[%c0_15, %c0_16, %c0_17] : memref<3x64x128xbf16, #tpu.memory_space<vmem>>, vector<1x64x128xbf16>
    %20 = vector.shape_cast %19 : vector<1x64x128xbf16> to vector<64x128xbf16>
    %cst_18 = arith.constant dense<0.000000e+00> : vector<16x128xf32>
    %21 = tpu.matmul %3, %20, %cst_18 {dimension_numbers = #tpu.dot_dimension_numbers<[1], [0], [0], [1], [0, 0, 1, 1], [], []>} : vector<16x64xbf16>, vector<64x128xbf16>, vector<16x128xf32> -> vector<16x128xf32>
    %c1_19 = arith.constant 1 : index
    %c0_20 = arith.constant 0 : index
    %c0_21 = arith.constant 0 : index
    %22 = vector.load %arg1[%c1_19, %c0_20, %c0_21] : memref<3x64x128xbf16, #tpu.memory_space<vmem>>, vector<1x64x128xbf16>
    %23 = vector.shape_cast %22 : vector<1x64x128xbf16> to vector<64x128xbf16>
    %cst_22 = arith.constant dense<0.000000e+00> : vector<16x128xf32>
    %24 = tpu.matmul %5, %23, %cst_22 {dimension_numbers = #tpu.dot_dimension_numbers<[1], [0], [0], [1], [0, 0, 1, 1], [], []>} : vector<16x64xbf16>, vector<64x128xbf16>, vector<16x128xf32> -> vector<16x128xf32>
    %25 = arith.addf %21, %24 : vector<16x128xf32>
    %c2_23 = arith.constant 2 : index
    %c0_24 = arith.constant 0 : index
    %c0_25 = arith.constant 0 : index
    %26 = vector.load %arg1[%c2_23, %c0_24, %c0_25] : memref<3x64x128xbf16, #tpu.memory_space<vmem>>, vector<1x64x128xbf16>
    %27 = vector.shape_cast %26 : vector<1x64x128xbf16> to vector<64x128xbf16>
    %cst_26 = arith.constant dense<0.000000e+00> : vector<16x128xf32>
    %28 = tpu.matmul %7, %27, %cst_26 {dimension_numbers = #tpu.dot_dimension_numbers<[1], [0], [0], [1], [0, 0, 1, 1], [], []>} : vector<16x64xbf16>, vector<64x128xbf16>, vector<16x128xf32> -> vector<16x128xf32>
    %29 = arith.addf %25, %28 : vector<16x128xf32>
    %30 = arith.maximumf %18, %29 : vector<16x128xf32>
    %31 = vector.extract_strided_slice %30 {offsets = [0, 0], sizes = [16, 64], strides = [1, 1]} : vector<16x128xf32> to vector<16x64xf32>
    %32 = vector.extract_strided_slice %30 {offsets = [0, 64], sizes = [16, 64], strides = [1, 1]} : vector<16x128xf32> to vector<16x64xf32>
    %33 = arith.maximumf %31, %32 : vector<16x64xf32>
    %c0_27 = arith.constant 0 : index
    %c0_28 = arith.constant 0 : index
    %34 = vector.load %arg2[%c0_27, %c0_28] : memref<1x64xf32, #tpu.memory_space<vmem>>, vector<1x64xf32>
    %35 = vector.broadcast %34 : vector<1x64xf32> to vector<16x64xf32>
    %36 = arith.addf %33, %35 : vector<16x64xf32>
    %cst_29 = arith.constant 0.000000e+00 : f32
    %37 = vector.broadcast %cst_29 : f32 to vector<16x64xf32>
    %38 = arith.maximumf %36, %37 : vector<16x64xf32>
    %c0_30 = arith.constant 0 : index
    %c0_31 = arith.constant 0 : index
    %39 = vector.load %arg8[%c0_30, %c0_31] : memref<16x64xf32, #tpu.memory_space<vmem>>, vector<16x64xf32>
    tpu.vector_store %arg8[%c0_30, %c0_31], %38 {strides = array<i32>} : memref<16x64xf32, #tpu.memory_space<vmem>>, vector<16x64xf32>,
    %c0_32 = arith.constant 0 : index
    %c0_33 = arith.constant 0 : index
    %40 = tpu.strided_load %arg8[%c0_32, %c0_33] {strides = array<i32: 8, 1>} : memref<16x64xf32, #tpu.memory_space<vmem>>, vector<2x64xf32>
    %41 = arith.truncf %40 : vector<2x64xf32> to vector<2x64xbf16>
    %c0_34 = arith.constant 0 : index
    %c0_35 = arith.constant 0 : index
    %c0_36 = arith.constant 0 : index
    %42 = vector.load %arg3[%c0_34, %c0_35, %c0_36] : memref<7x64x32xbf16, #tpu.memory_space<vmem>>, vector<1x64x32xbf16>
    %43 = vector.shape_cast %42 : vector<1x64x32xbf16> to vector<64x32xbf16>
    %cst_37 = arith.constant dense<0.000000e+00> : vector<2x32xf32>
    %44 = tpu.matmul %41, %43, %cst_37 {dimension_numbers = #tpu.dot_dimension_numbers<[1], [0], [0], [1], [0, 0, 1, 1], [], []>} : vector<2x64xbf16>, vector<64x32xbf16>, vector<2x32xf32> -> vector<2x32xf32>
    %c1_38 = arith.constant 1 : index
    %c0_39 = arith.constant 0 : index
    %45 = tpu.strided_load %arg8[%c1_38, %c0_39] {strides = array<i32: 8, 1>} : memref<16x64xf32, #tpu.memory_space<vmem>>, vector<2x64xf32>
    %46 = arith.truncf %45 : vector<2x64xf32> to vector<2x64xbf16>
    %c1_40 = arith.constant 1 : index
    %c0_41 = arith.constant 0 : index
    %c0_42 = arith.constant 0 : index
    %47 = vector.load %arg3[%c1_40, %c0_41, %c0_42] : memref<7x64x32xbf16, #tpu.memory_space<vmem>>, vector<1x64x32xbf16>
    %48 = vector.shape_cast %47 : vector<1x64x32xbf16> to vector<64x32xbf16>
    %cst_43 = arith.constant dense<0.000000e+00> : vector<2x32xf32>
    %49 = tpu.matmul %46, %48, %cst_43 {dimension_numbers = #tpu.dot_dimension_numbers<[1], [0], [0], [1], [0, 0, 1, 1], [], []>} : vector<2x64xbf16>, vector<64x32xbf16>, vector<2x32xf32> -> vector<2x32xf32>
    %c2_44 = arith.constant 2 : index
    %c0_45 = arith.constant 0 : index
    %50 = tpu.strided_load %arg8[%c2_44, %c0_45] {strides = array<i32: 8, 1>} : memref<16x64xf32, #tpu.memory_space<vmem>>, vector<2x64xf32>
    %51 = arith.truncf %50 : vector<2x64xf32> to vector<2x64xbf16>
    %c2_46 = arith.constant 2 : index
    %c0_47 = arith.constant 0 : index
    %c0_48 = arith.constant 0 : index
    %52 = vector.load %arg3[%c2_46, %c0_47, %c0_48] : memref<7x64x32xbf16, #tpu.memory_space<vmem>>, vector<1x64x32xbf16>
    %53 = vector.shape_cast %52 : vector<1x64x32xbf16> to vector<64x32xbf16>
    %cst_49 = arith.constant dense<0.000000e+00> : vector<2x32xf32>
    %54 = tpu.matmul %51, %53, %cst_49 {dimension_numbers = #tpu.dot_dimension_numbers<[1], [0], [0], [1], [0, 0, 1, 1], [], []>} : vector<2x64xbf16>, vector<64x32xbf16>, vector<2x32xf32> -> vector<2x32xf32>
    %c3_50 = arith.constant 3 : index
    %c0_51 = arith.constant 0 : index
    %55 = tpu.strided_load %arg8[%c3_50, %c0_51] {strides = array<i32: 8, 1>} : memref<16x64xf32, #tpu.memory_space<vmem>>, vector<2x64xf32>
    %56 = arith.truncf %55 : vector<2x64xf32> to vector<2x64xbf16>
    %c3_52 = arith.constant 3 : index
    %c0_53 = arith.constant 0 : index
    %c0_54 = arith.constant 0 : index
    %57 = vector.load %arg3[%c3_52, %c0_53, %c0_54] : memref<7x64x32xbf16, #tpu.memory_space<vmem>>, vector<1x64x32xbf16>
    %58 = vector.shape_cast %57 : vector<1x64x32xbf16> to vector<64x32xbf16>
    %cst_55 = arith.constant dense<0.000000e+00> : vector<2x32xf32>
    %59 = tpu.matmul %56, %58, %cst_55 {dimension_numbers = #tpu.dot_dimension_numbers<[1], [0], [0], [1], [0, 0, 1, 1], [], []>} : vector<2x64xbf16>, vector<64x32xbf16>, vector<2x32xf32> -> vector<2x32xf32>
    %c4 = arith.constant 4 : index
    %c0_56 = arith.constant 0 : index
    %60 = tpu.strided_load %arg8[%c4, %c0_56] {strides = array<i32: 8, 1>} : memref<16x64xf32, #tpu.memory_space<vmem>>, vector<2x64xf32>
    %61 = arith.truncf %60 : vector<2x64xf32> to vector<2x64xbf16>
    %c4_57 = arith.constant 4 : index
    %c0_58 = arith.constant 0 : index
    %c0_59 = arith.constant 0 : index
    %62 = vector.load %arg3[%c4_57, %c0_58, %c0_59] : memref<7x64x32xbf16, #tpu.memory_space<vmem>>, vector<1x64x32xbf16>
    %63 = vector.shape_cast %62 : vector<1x64x32xbf16> to vector<64x32xbf16>
    %cst_60 = arith.constant dense<0.000000e+00> : vector<2x32xf32>
    %64 = tpu.matmul %61, %63, %cst_60 {dimension_numbers = #tpu.dot_dimension_numbers<[1], [0], [0], [1], [0, 0, 1, 1], [], []>} : vector<2x64xbf16>, vector<64x32xbf16>, vector<2x32xf32> -> vector<2x32xf32>
    %c5 = arith.constant 5 : index
    %c0_61 = arith.constant 0 : index
    %65 = tpu.strided_load %arg8[%c5, %c0_61] {strides = array<i32: 8, 1>} : memref<16x64xf32, #tpu.memory_space<vmem>>, vector<2x64xf32>
    %66 = arith.truncf %65 : vector<2x64xf32> to vector<2x64xbf16>
    %c5_62 = arith.constant 5 : index
    %c0_63 = arith.constant 0 : index
    %c0_64 = arith.constant 0 : index
    %67 = vector.load %arg3[%c5_62, %c0_63, %c0_64] : memref<7x64x32xbf16, #tpu.memory_space<vmem>>, vector<1x64x32xbf16>
    %68 = vector.shape_cast %67 : vector<1x64x32xbf16> to vector<64x32xbf16>
    %cst_65 = arith.constant dense<0.000000e+00> : vector<2x32xf32>
    %69 = tpu.matmul %66, %68, %cst_65 {dimension_numbers = #tpu.dot_dimension_numbers<[1], [0], [0], [1], [0, 0, 1, 1], [], []>} : vector<2x64xbf16>, vector<64x32xbf16>, vector<2x32xf32> -> vector<2x32xf32>
    %c6 = arith.constant 6 : index
    %c0_66 = arith.constant 0 : index
    %70 = tpu.strided_load %arg8[%c6, %c0_66] {strides = array<i32: 8, 1>} : memref<16x64xf32, #tpu.memory_space<vmem>>, vector<2x64xf32>
    %71 = arith.truncf %70 : vector<2x64xf32> to vector<2x64xbf16>
    %c6_67 = arith.constant 6 : index
    %c0_68 = arith.constant 0 : index
    %c0_69 = arith.constant 0 : index
    %72 = vector.load %arg3[%c6_67, %c0_68, %c0_69] : memref<7x64x32xbf16, #tpu.memory_space<vmem>>, vector<1x64x32xbf16>
    %73 = vector.shape_cast %72 : vector<1x64x32xbf16> to vector<64x32xbf16>
    %cst_70 = arith.constant dense<0.000000e+00> : vector<2x32xf32>
    %74 = tpu.matmul %71, %73, %cst_70 {dimension_numbers = #tpu.dot_dimension_numbers<[1], [0], [0], [1], [0, 0, 1, 1], [], []>} : vector<2x64xbf16>, vector<64x32xbf16>, vector<2x32xf32> -> vector<2x32xf32>
    %75 = arith.addf %44, %49 : vector<2x32xf32>
    %76 = arith.addf %54, %59 : vector<2x32xf32>
    %77 = arith.addf %64, %69 : vector<2x32xf32>
    %78 = arith.addf %75, %76 : vector<2x32xf32>
    %79 = arith.addf %77, %74 : vector<2x32xf32>
    %80 = arith.addf %78, %79 : vector<2x32xf32>
    %c0_71 = arith.constant 0 : index
    %c0_72 = arith.constant 0 : index
    %81 = vector.load %arg4[%c0_71, %c0_72] : memref<1x32xf32, #tpu.memory_space<vmem>>, vector<1x32xf32>
    %82 = vector.broadcast %81 : vector<1x32xf32> to vector<2x32xf32>
    %83 = arith.addf %80, %82 : vector<2x32xf32>
    %cst_73 = arith.constant 0.000000e+00 : f32
    %84 = vector.broadcast %cst_73 : f32 to vector<2x32xf32>
    %85 = arith.maximumf %83, %84 : vector<2x32xf32>
    %86 = arith.truncf %85 : vector<2x32xf32> to vector<2x32xbf16>
    %c0_74 = arith.constant 0 : index
    %c0_75 = arith.constant 0 : index
    %87 = vector.load %arg5[%c0_74, %c0_75] : memref<32x10xbf16, #tpu.memory_space<vmem>>, vector<32x10xbf16>
    %cst_76 = arith.constant dense<0.000000e+00> : vector<2x10xf32>
    %88 = tpu.matmul %86, %87, %cst_76 {dimension_numbers = #tpu.dot_dimension_numbers<[1], [0], [0], [1], [0, 0, 1, 1], [], []>} : vector<2x32xbf16>, vector<32x10xbf16>, vector<2x10xf32> -> vector<2x10xf32>
    %c0_77 = arith.constant 0 : index
    %c0_78 = arith.constant 0 : index
    %89 = vector.load %arg6[%c0_77, %c0_78] : memref<1x10xf32, #tpu.memory_space<vmem>>, vector<1x10xf32>
    %90 = vector.broadcast %89 : vector<1x10xf32> to vector<2x10xf32>
    %91 = arith.addf %88, %90 : vector<2x10xf32>
    %c0_79 = arith.constant 0 : index
    %c0_80 = arith.constant 0 : index
    %92 = vector.load %arg7[%c0_79, %c0_80] : memref<2x10xf32, #tpu.memory_space<vmem>>, vector<2x10xf32>
    tpu.vector_store %arg7[%c0_79, %c0_80], %91 {strides = array<i32>} : memref<2x10xf32, #tpu.memory_space<vmem>>, vector<2x10xf32>,
    return
  }
}

</mosaic_0001>

<bundles_post_ra>
// kernel: model_forward.1
= control target key start
LH: loop header
LB: loop body
LE: loop exit
PB: predicated region body
PF: predicated region fallthrough
CT: control target
= control target key end

     0   :  { %v1510_v1 = vmov 0.0   ;;  %vm1511_vm0 = vmmov 0   ;;  %vm88_vm1 = vcmask 523264   ;;  %s1813_s0 = inlined_call_operand.vmem [shape: f32[34,64], index: 0, kind: input, shape index: {}]   ;;  %s1814_s1 = inlined_call_operand.vmem [shape: bf16[3,64,128], index: 1, kind: input, shape index: {}]   ;;  %s1815_s2 = inlined_call_operand.vmem [shape: f32[1,64], index: 2, kind: input, shape index: {}]   ;;  %s1816_s3 = inlined_call_operand.vmem [shape: bf16[7,64,32], index: 3, kind: input, shape index: {}]   ;;  %s1817_s4 = inlined_call_operand.vmem [shape: f32[1,32], index: 4, kind: input, shape index: {}]   ;;  %s1818_s5 = inlined_call_operand.vmem [shape: bf16[32,10], index: 5, kind: input, shape index: {}]   ;;  %s1819_s6 = inlined_call_operand.vmem [shape: f32[1,10], index: 6, kind: input, shape index: {}]   ;;  %s1820_s7 = inlined_call_operand.hbm [shape: f32[2,10], index: 7, kind: output, shape index: {}]  }
   0x1   :  { %v1446_v0 = vld [vmem:[%s1814_s1 + $0x38] sm:$0xff]   ;;  %1278 = vmatprep.subr.bf16.mxu0 %v1510_v1  ;;  %1290 = vmatprep.subr.bf16.mxu1 %v1510_v1  ;;  %v1448_v3 = vld [vmem:[%s1814_s1 + $0x30] sm:$0xff]   ;;  %v1450_v5 = vld [vmem:[%s1814_s1 + $0x28] sm:$0xff]  }
   0x2   :  { %v1447_v2 = vld [vmem:[%s1814_s1 + $0x18] sm:$0xff]   ;;  %1279 = vmatpush3.bf16.msra.mxu0 %v1446_v0  ;;  %1286 = vmatprep.mubr.msk.bf16.mxu0 %vm1511_vm0, %v1510_v1  ;;  %v1449_v4 = vld [vmem:[%s1814_s1 + $0x10] sm:$0xff]   ;;  %v1451_v6 = vld [vmem:[%s1814_s1 + $0x8] sm:$0xff]  }
   0x3   :  { %1291 = vmatpush3.bf16.msra.mxu1 %v1447_v2  ;;  %1280 = vmatprep.subr.bf16.mxu0 %v1510_v1  ;;  %v1452_v7 = vld [vmem:[%s1814_s1 + $0x20] sm:$0xff]   ;;  %v1082_v10 = vld [vmem:[%s1813_s0 + $0x11] ss:$2 sm:$0xff]  ;;  %v1080_v12 = vld [vmem:[%s1813_s0 + $0x10] ss:$2 sm:$0xff] }
   0x4   :  { %1292 = vmatprep.subr.bf16.mxu1 %v1510_v1  ;;  %1298 = vmatprep.mubr.msk.bf16.mxu1 %vm1511_vm0, %v1510_v1  ;;  %v1081_v8 = vld [vmem:[%s1813_s0 + $0x1] ss:$2 sm:$0xff]  ;;  %v28_v11 = vld [vmem:[%s1813_s0] ss:$2 sm:$0xff]  ;;  %v1454_v15 = vld [vmem:[%s1814_s1 + $0x58] sm:$0xff]  }
   0x5   :  { %v1453_v9 = vld [vmem:[%s1814_s1] sm:$0xff]   ;;  %v36_v13 = vpack.c.bf16 %v1082_v10, %v1081_v8  ;;  %v31_v14 = vpack.c.bf16 %v1080_v12, %v28_v11  ;;  %v1455_v16 = vld [vmem:[%s1814_s1 + $0x50] sm:$0xff]   ;;  %v1456_v17 = vld [vmem:[%s1814_s1 + $0x48] sm:$0xff]  }
   0x6   :  { %1281 = vmatpush3.bf16.msra.mxu0 %v1448_v3  ;;  %v1457_v18 = vld [vmem:[%s1814_s1 + $0x40] sm:$0xff]  }
   0x7   :  { %1293 = vmatpush3.bf16.msra.mxu1 %v1449_v4  ;;  %1282 = vmatprep.subr.bf16.mxu0 %v1510_v1  ;;  %v1083_v19 = vld [vmem:[%s1813_s0 + $0x2] ss:$2 sm:$0xff]  ;;  %v1084_v20 = vld [vmem:[%s1813_s0 + $0x12] ss:$2 sm:$0xff] }
   0x8   :  { %1294 = vmatprep.subr.bf16.mxu1 %v1510_v1  ;;  %v41_v21 = vpack.c.bf16 %v1084_v20, %v1083_v19 }
   0xa   :  { %1283 = vmatpush3.bf16.msra.mxu0 %v1450_v5 }
   0xb   :  { %1295 = vmatpush3.bf16.msra.mxu1 %v1451_v6  ;;  %1284 = vmatprep.subr.bf16.mxu0 %v1510_v1 }
   0xc   :  { %1296 = vmatprep.subr.bf16.mxu1 %v1510_v1 }
   0xe   :  { %1285 = vmatpush3.bf16.msra.mxu0 %v1452_v7 }
   0xf   :  { %1297 = vmatpush3.bf16.msra.mxu1 %v1453_v9  ;;  %1302 = vmatprep.subr.bf16.mxu0 %v1510_v1 }
  0x10   :  { %1314 = vmatprep.subr.bf16.mxu1 %v1510_v1 }
  0x11   :  { %1287 = vmatmul.mubr.msk.bf16.vlgmr.msra.gmra.mxu0 %vm88_vm1, %v36_v13 }
  0x12   :  { %1299 = vmatmul.mubr.msk.bf16.vlgmr.msra.gmra.mxu1 %vm88_vm1, %v31_v14  ;;  %1303 = vmatpush3.bf16.msra.mxu0 %v1454_v15 }
  0x13   :  { %1315 = vmatpush3.bf16.msra.mxu1 %v1446_v0  ;;  %1304 = vmatprep.subr.bf16.mxu0 %v1510_v1 }
  0x14   :  { %1316 = vmatprep.subr.bf16.mxu1 %v1510_v1  ;;  %1310 = vmatprep.mubr.msk.bf16.mxu0 %vm1511_vm0, %v1510_v1 }
  0x15   :  { %1322 = vmatprep.mubr.msk.bf16.mxu1 %vm1511_vm0, %v1510_v1 }
  0x16   :  { %1305 = vmatpush3.bf16.msra.mxu0 %v1455_v16 }
  0x17   :  { %1317 = vmatpush3.bf16.msra.mxu1 %v1448_v3  ;;  %1306 = vmatprep.subr.bf16.mxu0 %v1510_v1 }
  0x18   :  { %1318 = vmatprep.subr.bf16.mxu1 %v1510_v1 }
  0x1a   :  { %1307 = vmatpush3.bf16.msra.mxu0 %v1456_v17 }
  0x1b   :  { %1319 = vmatpush3.bf16.msra.mxu1 %v1450_v5  ;;  %1308 = vmatprep.subr.bf16.mxu0 %v1510_v1 }
  0x1c   :  { %1320 = vmatprep.subr.bf16.mxu1 %v1510_v1 }
  0x1e   :  { %1309 = vmatpush3.bf16.msra.mxu0 %v1457_v18 }
  0x1f   :  { %1321 = vmatpush3.bf16.msra.mxu1 %v1452_v7  ;;  %1326 = vmatprep.subr.bf16.mxu0 %v1510_v1 }
  0x20   :  { %1338 = vmatprep.subr.bf16.mxu1 %v1510_v1 }
  0x21   :  { %1311 = vmatmul.mubr.msk.bf16.vlgmr.msra.gmra.mxu0 %vm88_vm1, %v41_v21 }
  0x22   :  { %1323 = vmatmul.mubr.msk.bf16.vlgmr.msra.gmra.mxu1 %vm88_vm1, %v41_v21  ;;  %1327 = vmatpush3.bf16.msra.mxu0 %v1447_v2 }
  0x23   :  { %12 = vsyncpa [#allocation4], 0  ;;  %1339 = vmatpush3.bf16.msra.mxu1 %v1454_v15  ;;  %1328 = vmatprep.subr.bf16.mxu0 %v1510_v1  ;;  %v1085_v22 = vld [vmem:[%s1813_s0 + $0x3] ss:$2 sm:$0xff]  ;;  %v1086_v23 = vld [vmem:[%s1813_s0 + $0x13] ss:$2 sm:$0xff] }
  0x24   :  { %1340 = vmatprep.subr.bf16.mxu1 %v1510_v1  ;;  %1334 = vmatprep.mubr.msk.bf16.mxu0 %vm1511_vm0, %v1510_v1  ;;  %v46_v24 = vpack.c.bf16 %v1086_v23, %v1085_v22  ;;  %v1458_v41 = vld [vmem:[%s1816_s3 + $0x38] sm:$0xff]   ;;  %v1460_v47 = vld [vmem:[%s1816_s3 + $0x30] sm:$0xff]   ;;  %v1462_v54 = vld [vmem:[%s1816_s3 + $0x28] sm:$0xff]   ;;  %s1512_s28 = smov 64   ;;  %vm1020_vm2 = vcmask 261120   ;;  %s1513_s29 = smov [#allocation3]  }
  0x25   :  { %1346 = vmatprep.mubr.msk.bf16.mxu1 %vm1511_vm0, %v1510_v1  ;;  %v1459_v42 = vld [vmem:[%s1816_s3 + $0x78] sm:$0xff]   ;;  %v1461_v48 = vld [vmem:[%s1816_s3 + $0x70] sm:$0xff]   ;;  %v1463_v55 = vld [vmem:[%s1816_s3 + $0x68] sm:$0xff]   ;;  %s1072_s30 = sshll.u32 %s1513_s29, 4  ;;  %vm1064_vm3 = vcmask 74752   ;;  %s1073_s30 = int_to_ptr.vmem [resolvable:$true] %s1072_s30 }
  0x26   :  { %1329 = vmatpush3.bf16.msra.mxu0 %v1449_v4  ;;  %v1464_v0 = vld [vmem:[%s1816_s3 + $0x20] sm:$0xff]   ;;  %v1467_v14 = vld [vmem:[%s1816_s3 + $0xd8] sm:$0xff]   ;;  %v1468_v19 = vld [vmem:[%s1816_s3 + $0xb0] sm:$0xff]   ;;  %p1493_p1 = scmp.lt.s32.totalorder %s1073_s30, %s1073_s30 }
  0x27   :  { %1341 = vmatpush3.bf16.msra.mxu1 %v1455_v16  ;;  %1330 = vmatprep.subr.bf16.mxu0 %v1510_v1  ;;  %v1465_v2 = vld [vmem:[%s1816_s3 + $0x60] sm:$0xff]   ;;  %v1469_v20 = vld [vmem:[%s1816_s3 + $0xd0] sm:$0xff]   ;;  %v1470_v21 = vld [vmem:[%s1816_s3 + $0xa8] sm:$0xff]  }
  0x28   :  { %1342 = vmatprep.subr.bf16.mxu1 %v1510_v1  ;;  %v1121_v4 = vld [vmem:[%s1815_s2] ss:$0 sm:$0xff]  ;;  %v1471_v22 = vld [vmem:[%s1816_s3 + $0xc8] sm:$0xff]  }
  0x29   :  { %v1472_v23 = vld [vmem:[%s1816_s3 + $0xa0] sm:$0xff]  }
  0x2a   :  { %1331 = vmatpush3.bf16.msra.mxu0 %v1451_v6 }
  0x2b   :  { %1343 = vmatpush3.bf16.msra.mxu1 %v1456_v17  ;;  %1332 = vmatprep.subr.bf16.mxu0 %v1510_v1 }
  0x2c   :  { %1344 = vmatprep.subr.bf16.mxu1 %v1510_v1 }
  0x2e   :  { %1333 = vmatpush3.bf16.msra.mxu0 %v1453_v9 }
  0x2f   :  { %1345 = vmatpush3.bf16.msra.mxu1 %v1457_v18  ;;  %1350 = vmatprep.subr.bf16.mxu0 %v1510_v1 }
  0x30   :  { %1362 = vmatprep.subr.bf16.mxu1 %v1510_v1 }
  0x31   :  { %1335 = vmatmul.mubr.msk.bf16.vlgmr.msra.gmra.mxu0 %vm88_vm1, %v36_v13  ;;  %v1466_v13 = vld [vmem:[%s1816_s3 + $0xb8] sm:$0xff]  }
  0x32   :  { %1347 = vmatmul.mubr.msk.bf16.vlgmr.msra.gmra.mxu1 %vm88_vm1, %v46_v24  ;;  %1358 = vmatprep.mubr.msk.bf16.mxu0 %vm1511_vm0, %v1510_v1  ;;  %v1473_v24 = vld [vmem:[%s1816_s3 + $0xc0] sm:$0xff]  }
  0x33   :  { %1370 = vmatprep.mubr.msk.bf16.mxu1 %vm1511_vm0, %v1510_v1  ;;  %1351 = vmatpush3.bf16.msra.mxu0 %v1458_v41 }
  0x34   :  { %1363 = vmatpush3.bf16.msra.mxu1 %v1459_v42  ;;  %1352 = vmatprep.subr.bf16.mxu0 %v1510_v1  ;;  %v1483_v42 = vld [vmem:[%s1816_s3 + $0x90] sm:$0xff]  }
  0x35   :  { %1364 = vmatprep.subr.bf16.mxu1 %v1510_v1 }
  0x37   :  { %1353 = vmatpush3.bf16.msra.mxu0 %v1460_v47  ;;  %v1486_v47 = vld [vmem:[%s1818_s5 + $0x8] sm:$0xff]  }
  0x38   :  { %1365 = vmatpush3.bf16.msra.mxu1 %v1461_v48  ;;  %1354 = vmatprep.subr.bf16.mxu0 %v1510_v1  ;;  %v1487_v48 = vld [vmem:[%s1818_s5] sm:$0xff]  }
  0x39   :  { %1366 = vmatprep.subr.bf16.mxu1 %v1510_v1 }
  0x3b   :  { %1355 = vmatpush3.bf16.msra.mxu0 %v1462_v54 }
  0x3c   :  { %1367 = vmatpush3.bf16.msra.mxu1 %v1463_v55  ;;  %1356 = vmatprep.subr.bf16.mxu0 %v1510_v1 }
  0x3d   :  { %1368 = vmatprep.subr.bf16.mxu1 %v1510_v1 }
  0x3f   :  { %1357 = vmatpush3.bf16.msra.mxu0 %v1464_v0 }
  0x40   :  { %1369 = vmatpush3.bf16.msra.mxu1 %v1465_v2  ;;  %1374 = vmatprep.subr.bf16.mxu0 %v1510_v1 }
  0x41   :  { %1386 = vmatprep.subr.bf16.mxu1 %v1510_v1 }
  0xd1   :  { %v126_v25 = vpop.f32.mrf.mxu0 }
  0xd2   :  { %v194_v26 = vpop.f32.mrf.mxu1 }
  0xd3   :  { %v1288_v27 = vpop.f32.mrf.mxu0  ;;  %v195_v44 = vadd.f32 %v194_v26, %v126_v25 }
  0xd4   :  { %v1300_v28 = vpop.f32.mrf.mxu1  ;;  %v1474_v27 = vld [vmem:[%s1816_s3 + $0x18] sm:$0xff]  }
  0xd5   :  { %v129_v29 = vpop.f32.mrf.mxu0  ;;  %v1475_v28 = vld [vmem:[%s1816_s3 + $0x58] sm:$0xff]  }
  0xd6   :  { %v197_v30 = vpop.f32.mrf.mxu1 }
  0xd7   :  { %v1289_v31 = vpop.f32.mrf.mxu0  ;;  %v198_v56 = vadd.f32 %v197_v30, %v129_v29 }
  0xd8   :  { %v1301_v32 = vpop.f32.mrf.mxu1  ;;  %v1476_v31 = vld [vmem:[%s1816_s3 + $0x10] sm:$0xff]  }
  0xd9   :  { %v1477_v32 = vld [vmem:[%s1816_s3 + $0x50] sm:$0xff]  }
  0xe1   :  { %v271_v33 = vpop.f32.mrf.mxu0 }
  0xe2   :  { %v314_v34 = vpop.f32.mrf.mxu1  ;;  %v278_v50 = vadd.f32 %v271_v33, %v195_v44  ;;  %v1478_v33 = vld [vmem:[%s1816_s3 + $0x8] sm:$0xff]   ;;  %v1485_v44 = vld [vmem:[%s1816_s3 + $0x80] sm:$0xff]  }
  0xe3   :  { %v1312_v35 = vpop.f32.mrf.mxu0 }
  0xe4   :  { %v1324_v36 = vpop.f32.mrf.mxu1  ;;  %v1480_v35 = vld [vmem:[%s1816_s3] sm:$0xff]  }
  0xe5   :  { %v274_v37 = vpop.f32.mrf.mxu0  ;;  %v1481_v36 = vld [vmem:[%s1816_s3 + $0x40] sm:$0xff]  }
  0xe6   :  { %v317_v38 = vpop.f32.mrf.mxu1  ;;  %v279_v61 = vadd.f32 %v274_v37, %v198_v56 }
  0xe7   :  { %v1313_v39 = vpop.f32.mrf.mxu0 }
  0xe8   :  { %v1325_v40 = vpop.f32.mrf.mxu1  ;;  %v1482_v39 = vld [vmem:[%s1816_s3 + $0x98] sm:$0xff]  }
  0xf1   :  { %v355_v43 = vpop.f32.mrf.mxu0 }
  0xf2   :  { %v356_v45 = vadd.f32 %v355_v43, %v314_v34  ;;  %v399_v46 = vpop.f32.mrf.mxu1  ;;  %v1479_v34 = vld [vmem:[%s1816_s3 + $0x48] sm:$0xff]  }
  0xf3   :  { %v1336_v49 = vpop.f32.mrf.mxu0  ;;  %v1484_v43 = vld [vmem:[%s1816_s3 + $0x88] sm:$0xff]  }
  0xf4   :  { %v406_v51 = vadd.f32 %v399_v46, %v356_v45  ;;  %v1348_v52 = vpop.f32.mrf.mxu1 }
  0xf5   :  { %v358_v53 = vpop.f32.mrf.mxu0 }
  0xf6   :  { %v359_v57 = vadd.f32 %v358_v53, %v317_v38  ;;  %v402_v58 = vpop.f32.mrf.mxu1  ;;  %v408_v59 = vmax.f32 %v278_v50, %v406_v51 }
  0xf7   :  { %v1337_v60 = vpop.f32.mrf.mxu0 }
  0xf8   :  { %v407_v62 = vadd.f32 %v402_v58, %v359_v57  ;;  %v1349_v63 = vpop.f32.mrf.mxu1  ;;  %412 = vrot.lane.b32.xlu0 %v408_v59, %s1512_s28 }
  0xfa   :  { %v409_v3 = vmax.f32 %v279_v61, %v407_v62 }
  0xfc   :  { %414 = vrot.lane.b32.xlu0 %v409_v3, %s1512_s28 }
 0x16a   :  { %v413_v5 = vpop.permute.xlu0 %412 }
 0x16b   :  { %v418_v6 = vmax.f32 %v408_v59, %v413_v5 }
 0x16d   :  { %v427_v7 = vadd.f32 %v1121_v4, %v418_v6 }
 0x16e   :  { %v415_v8 = vpop.permute.xlu0 %414 }
 0x16f   :  { %v429_v9 = vmax.f32 %v427_v7, 0.0  ;;  %v419_v10 = vmax.f32 %v409_v3, %v415_v8 }
 0x171   :  { %431 = vst.msk [vmem:[#allocation2] sm:$0xff] %vm88_vm1, %v429_v9  ;;  %v428_v11 = vadd.f32 %v1121_v4, %v419_v10 }
 0x173   :  { %v430_v12 = vmax.f32 %v428_v11, 0.0 }
 0x175   :  { %432 = vst.msk [vmem:[#allocation2 + $0x8] sm:$0xff] %vm88_vm1, %v430_v12 }
 0x17c   :  { %v444_v15 = vld [vmem:[#allocation2 + $0x1] ss:$8 sm:$0x3]  ;;  %v535_v16 = vld [vmem:[#allocation2 + $0x3] ss:$8 sm:$0x3] }
 0x17d   :  { %v445_v17 = vpack.c.bf16 %v444_v15, %v444_v15  ;;  %v536_v18 = vpack.c.bf16 %v535_v16, %v535_v16  ;;  %v626_v25 = vld [vmem:[#allocation2 + $0x5] ss:$8 sm:$0x3]  ;;  %v705_v26 = vld [vmem:[#allocation2 + $0x6] ss:$8 sm:$0x3] }
 0x17e   :  { %v627_v29 = vpack.c.bf16 %v626_v25, %v626_v25  ;;  %v706_v30 = vpack.c.bf16 %v705_v26, %v705_v26  ;;  %v433_v37 = vld [vmem:[#allocation2] ss:$8 sm:$0x3]  ;;  %v523_v38 = vld [vmem:[#allocation2 + $0x2] ss:$8 sm:$0x3] }
 0x17f   :  { %1359 = vmatmul.mubr.msk.bf16.vlgmr.msra.gmra.mxu0 %vm88_vm1, %v445_v17  ;;  %1371 = vmatmul.mubr.msk.bf16.vlgmr.msra.gmra.mxu1 %vm88_vm1, %v536_v18  ;;  %v434_v40 = vpack.c.bf16 %v433_v37, %v433_v37  ;;  %v524_v41 = vpack.c.bf16 %v523_v38, %v523_v38  ;;  %v614_v45 = vld [vmem:[#allocation2 + $0x4] ss:$8 sm:$0x3]  ;;  %v1205_v16 = vld [vmem:[%s1817_s4] ss:$0 sm:$0xff]  ;;  %s1488_s4 = scalar_lea.vmem %s1073_s30, 32 }
 0x180   :  { %1375 = vmatpush3.bf16.msra.mxu0 %v1466_v13  ;;  %1387 = vmatpush3.bf16.msra.mxu1 %v1467_v14  ;;  %v615_v46 = vpack.c.bf16 %v614_v45, %v614_v45  ;;  %p1489_p0 = scmp.ne.s32.totalorder %s1073_s30, %s1488_s4  ;;  %p1494_p2 = scmp.lt.s32.totalorder %s1488_s4, %s1488_s4 }
 0x181   :  { %1376 = vmatprep.subr.bf16.mxu0 %v1510_v1  ;;  %1388 = vmatprep.subr.bf16.mxu1 %v1510_v1 }
 0x182   :  { %1382 = vmatprep.mubr.msk.bf16.mxu0 %vm1511_vm0, %v1510_v1  ;;  %1394 = vmatprep.mubr.msk.bf16.mxu1 %vm1511_vm0, %v1510_v1  ;;  %p1495_p3 = por %p1494_p2, %p1493_p1 }
 0x184   :  { %1377 = vmatpush3.bf16.msra.mxu0 %v1468_v19  ;;  %1389 = vmatpush3.bf16.msra.mxu1 %v1469_v20  ;;  %p1496_p4 = pnand %p1495_p3, %p1489_p0 }
 0x185   :  { %1378 = vmatprep.subr.bf16.mxu0 %v1510_v1  ;;  %1390 = vmatprep.subr.bf16.mxu1 %v1510_v1 }
 0x188   :  { %1379 = vmatpush3.bf16.msra.mxu0 %v1470_v21  ;;  %1391 = vmatpush3.bf16.msra.mxu1 %v1471_v22 }
 0x189   :  { %1380 = vmatprep.subr.bf16.mxu0 %v1510_v1  ;;  %1392 = vmatprep.subr.bf16.mxu1 %v1510_v1 }
 0x18c   :  { %1381 = vmatpush3.bf16.msra.mxu0 %v1472_v23  ;;  %1393 = vmatpush3.bf16.msra.mxu1 %v1473_v24  ;;  %v1206_v23 = vld [vmem:[%s1819_s6] ss:$0 sm:$0xff] }
 0x18d   :  { %1398 = vmatprep.subr.bf16.mxu0 %v1510_v1  ;;  %1410 = vmatprep.subr.bf16.mxu1 %v1510_v1 }
 0x18f   :  { %1383 = vmatmul.mubr.msk.bf16.vlgmr.msra.gmra.mxu0 %vm88_vm1, %v627_v29  ;;  %1395 = vmatmul.mubr.msk.bf16.vlgmr.msra.gmra.mxu1 %vm88_vm1, %v706_v30 }
 0x190   :  { %1399 = vmatpush3.bf16.msra.mxu0 %v1474_v27  ;;  %1411 = vmatpush3.bf16.msra.mxu1 %v1475_v28 }
 0x191   :  { %1400 = vmatprep.subr.bf16.mxu0 %v1510_v1  ;;  %1412 = vmatprep.subr.bf16.mxu1 %v1510_v1 }
 0x192   :  { %1406 = vmatprep.mubr.msk.bf16.mxu0 %vm1511_vm0, %v1510_v1  ;;  %1418 = vmatprep.mubr.msk.bf16.mxu1 %vm1511_vm0, %v1510_v1 }
 0x194   :  { %1401 = vmatpush3.bf16.msra.mxu0 %v1476_v31  ;;  %1413 = vmatpush3.bf16.msra.mxu1 %v1477_v32 }
 0x195   :  { %1402 = vmatprep.subr.bf16.mxu0 %v1510_v1  ;;  %1414 = vmatprep.subr.bf16.mxu1 %v1510_v1 }
 0x198   :  { %1403 = vmatpush3.bf16.msra.mxu0 %v1478_v33  ;;  %1415 = vmatpush3.bf16.msra.mxu1 %v1479_v34 }
 0x199   :  { %1404 = vmatprep.subr.bf16.mxu0 %v1510_v1  ;;  %1416 = vmatprep.subr.bf16.mxu1 %v1510_v1 }
 0x19c   :  { %1405 = vmatpush3.bf16.msra.mxu0 %v1480_v35  ;;  %1417 = vmatpush3.bf16.msra.mxu1 %v1481_v36 }
 0x19d   :  { %1422 = vmatprep.subr.bf16.mxu0 %v1510_v1  ;;  %1434 = vmatprep.subr.bf16.mxu1 %v1510_v1 }
 0x19f   :  { %1407 = vmatmul.mubr.msk.bf16.vlgmr.msra.gmra.mxu0 %vm88_vm1, %v434_v40  ;;  %1419 = vmatmul.mubr.msk.bf16.vlgmr.msra.gmra.mxu1 %vm88_vm1, %v524_v41 }
 0x1a0   :  { %1423 = vmatpush3.bf16.msra.mxu0 %v1482_v39  ;;  %1430 = vmatprep.mubr.msk.bf16.mxu0 %vm1511_vm0, %v1510_v1 }
 0x1a1   :  { %1424 = vmatprep.subr.bf16.mxu0 %v1510_v1  ;;  %1438 = vmatprep.mubr.msk.bf16.mxu1 %vm1511_vm0, %v1510_v1 }
 0x1a2   :  { %1435 = vmatpush3.bf16.msra.mxu1 %v1486_v47 }
 0x1a3   :  { %1436 = vmatprep.subr.bf16.mxu1 %v1510_v1 }
 0x1a4   :  { %1425 = vmatpush3.bf16.msra.mxu0 %v1483_v42 }
 0x1a5   :  { %1426 = vmatprep.subr.bf16.mxu0 %v1510_v1 }
 0x1a6   :  { %1437 = vmatpush3.bf16.msra.mxu1 %v1487_v48 }
 0x1a8   :  { %1427 = vmatpush3.bf16.msra.mxu0 %v1484_v43 }
 0x1a9   :  { %1428 = vmatprep.subr.bf16.mxu0 %v1510_v1 }
 0x1ac   :  { %1429 = vmatpush3.bf16.msra.mxu0 %v1485_v44 }
 0x1af   :  { %1431 = vmatmul.mubr.msk.bf16.vlgmr.msra.gmra.mxu0 %vm88_vm1, %v615_v46 }
 0x23f   :  { %v516_v49 = vpop.f32.mrf.mxu0  ;;  %v607_v50 = vpop.f32.mrf.mxu1 }
 0x241   :  { %v1360_v51 = vpop.f32.mrf.mxu0  ;;  %v1372_v52 = vpop.f32.mrf.mxu1 }
 0x243   :  { %v519_v53 = vpop.f32.mrf.mxu0  ;;  %v610_v54 = vpop.f32.mrf.mxu1 }
 0x245   :  { %v1361_v55 = vpop.f32.mrf.mxu0  ;;  %v1373_v56 = vpop.f32.mrf.mxu1 }
 0x24f   :  { %v698_v57 = vpop.f32.mrf.mxu0  ;;  %v777_v58 = vpop.f32.mrf.mxu1 }
 0x251   :  { %v1384_v59 = vpop.f32.mrf.mxu0  ;;  %v1396_v60 = vpop.f32.mrf.mxu1 }
 0x253   :  { %v701_v61 = vpop.f32.mrf.mxu0  ;;  %v780_v62 = vpop.f32.mrf.mxu1 }
 0x255   :  { %v1385_v1 = vpop.f32.mrf.mxu0  ;;  %v1397_v63 = vpop.f32.mrf.mxu1 }
 0x25f   :  { %v844_v0 = vpop.f32.mrf.mxu0  ;;  %v911_v2 = vpop.f32.mrf.mxu1 }
 0x260   :  { %v845_v9 = vadd.f32 %v844_v0, %v516_v49  ;;  %v912_v10 = vadd.f32 %v911_v2, %v607_v50 }
 0x261   :  { %v1408_v3 = vpop.f32.mrf.mxu0  ;;  %v1420_v4 = vpop.f32.mrf.mxu1 }
 0x262   :  { %v984_v14 = vadd.f32 %v912_v10, %v845_v9 }
 0x263   :  { %v847_v5 = vpop.f32.mrf.mxu0  ;;  %v914_v6 = vpop.f32.mrf.mxu1 }
 0x265   :  { %v1409_v7 = vpop.f32.mrf.mxu0  ;;  %v1421_v8 = vpop.f32.mrf.mxu1 }
 0x26f   :  { %v978_v11 = vpop.f32.mrf.mxu0 }
 0x270   :  { %v979_v12 = vadd.f32 %v978_v11, %v698_v57 }
 0x271   :  { %v1432_v13 = vpop.f32.mrf.mxu0 }
 0x272   :  { %v985_v15 = vadd.f32 %v979_v12, %v777_v58 }
 0x273   :  { %v981_v17 = vpop.f32.mrf.mxu0 }
 0x274   :  { %v986_v18 = vadd.f32 %v985_v15, %v984_v14 }
 0x275   :  { %v1433_v19 = vpop.f32.mrf.mxu0 }
 0x276   :  { %v994_v20 = vadd.f32 %v1205_v16, %v986_v18 }
 0x278   :  { %v995_v21 = vmax.f32 %v994_v20, 0.0 }
 0x27a   :  { %v996_v22 = vpack.c.bf16 %v995_v21, %v995_v21 }
 0x27c   :  { %1439 = vmatmul.mubr.msk.bf16.vlgmr.msra.gmra.mxu1 %vm1020_vm2, %v996_v22 }
 0x33c   :  { %v1058_v24 = vpop.f32.mrf.mxu1 }
 0x33d   :  { %v1059_v25 = vadd.f32 %v1206_v23, %v1058_v24 }
 0x33e   :  { %v1440_v26 = vpop.f32.mrf.mxu1 }
 0x33f   :  { %1065 = vst.msk [vmem:[#allocation3] sm:$0x3] %vm1064_vm3, %v1059_v25 }
 0x340   :  { %v1061_v27 = vpop.f32.mrf.mxu1 }
 0x341   :  { %1499 = shalt.err (!%p1496_p4)
}
 0x342   :  { %1075 = dma.vmem_to_hbm [thread:$0]  %s1073_s30, 32, %s1820_s7, [#allocation4]   ;;  %v1441_v28 = vpop.f32.mrf.mxu1 }
 0x343   :  { %1508 = dma.done.wait [#allocation4], 32  }
 0x344   :  { %1509 = vsyncadd [#allocation4], 4294967264 }
 0x345   :  { %1079 = vsyncpa [#allocation4], 1 }

</bundles_post_ra>
